<compile_context>
chip_gen: v6e
topology: v6e:2x2x1
jax: 0.10.0
libtpu: 0.0.40
codegen_flags: <defaults>
</compile_context>

<pallas_src>
import jax
import jax.numpy as jnp
from jax import lax
from jax.experimental import pallas as pl
from jax.experimental.pallas import tpu as pltpu


LANES = 128            # vreg lane width / last-dim tile
BLOCK_ROWS_MAX = 4096  # 4096*128*4B = 2 MiB per f32 input block
                       # (2 inputs x 2 pipeline buffers = 8 MiB of VMEM)
CHUNK_ROWS = 128       # in-kernel accumulation chunk (128x128 f32 = 64 KiB)


def _sq_diff_partial_kernel(vnew_ref, vref_ref, out_ref):
    """Per-grid-step partial sums of the squared displacement.

    vnew_ref / vref_ref : VMEM (block_rows, 128) lane-dense coordinate slabs
    out_ref             : VMEM (8, 128) partial-sum tile for this grid step

    The block is reduced in CHUNK_ROWS-row chunks so the live working set is a
    handful of vregs (no full-block difference/square temporaries in VMEM).
    """
    block_rows = vnew_ref.shape[0]
    chunk = min(CHUNK_ROWS, block_rows)
    num_full = block_rows // chunk                  # >= 1 (static)
    rem = block_rows - num_full * chunk             # static; multiple of 8

    def partial(start, n):
        # Upcast before subtracting (no-op for f32, avoids cancellation for bf16).
        a = vnew_ref[pl.ds(start, n), :].astype(jnp.float32)
        b = vref_ref[pl.ds(start, n), :].astype(jnp.float32)
        d = a - b
        s = d * d                                   # pure VPU
        # (n,128) -> (8,128): vector adds of (8,128) tiles, no XLU cross-lane
        # reduce inside the hot loop.
        return s.reshape(n // 8, 8, LANES).sum(axis=0)

    acc0 = jnp.zeros((8, LANES), jnp.float32)
    if num_full > 1:
        def body(c, acc):
            start = pl.multiple_of(c * chunk, chunk)
            return acc + partial(start, chunk)
        acc = lax.fori_loop(0, num_full, body, acc0, unroll=True)
    else:
        acc = acc0 + partial(0, chunk)
    if rem:
        acc = acc + partial(num_full * chunk, rem)

    out_ref[...] = acc


def _sublane_unit(dtype) -> int:
    # Minimum second-to-last-dim multiple for the dtype: 8 for 4-byte,
    # 16 for 2-byte, 32 for 1-byte element types.
    return max(8, 32 // jnp.dtype(dtype).itemsize)


def distortion_energy(weight, vert_new, vert_ref):
    """E = weight * sum ||vert_new - vert_ref||^2  (scalar f32)."""
    assert vert_new.shape == vert_ref.shape
    assert vert_new.dtype == vert_ref.dtype
    weight = jnp.asarray(weight, jnp.float32)
    total = vert_new.size

    # Keep narrow dtypes narrow through the DMA path; the kernel upcasts.
    a_flat = vert_new.reshape(-1)    # row-major flatten: free (no copy)
    b_flat = vert_ref.reshape(-1)

    unit = _sublane_unit(vert_new.dtype)
    rows = total // LANES            # complete lane-dense rows

    # ---- static block geometry (no input padding, no padded HBM copies) ----
    if rows >= unit:
        num_blocks = pl.cdiv(rows, BLOCK_ROWS_MAX)          # >= 1
        if num_blocks == 1 and rows >= 2 * unit:
            # >= 2 blocks so the "parallel" axis can shard over v7x's 2 TCs.
            num_blocks = 2
        block_rows = max(unit, ((rows // num_blocks) // unit) * unit)
        num_blocks = rows // block_rows
        bulk_rows = num_blocks * block_rows
    else:
        block_rows = num_blocks = bulk_rows = 0
    bulk = bulk_rows * LANES

    energy = jnp.float32(0.0)

    if num_blocks > 0:
        if bulk == total:
            # Exact fit: pure reshape, zero extra HBM traffic.
            a_slab = a_flat.reshape(bulk_rows, LANES)
            b_slab = b_flat.reshape(bulk_rows, LANES)
        else:
            # Block-aligned prefix.  allow_input_fusion (below) lets XLA fuse
            # this slice+reshape into the pallas_call operand instead of
            # materializing a second full copy of each input in HBM.
            a_slab = a_flat[:bulk].reshape(bulk_rows, LANES)
            b_slab = b_flat[:bulk].reshape(bulk_rows, LANES)

        item = jnp.dtype(vert_new.dtype).itemsize
        partials = pl.pallas_call(
            _sq_diff_partial_kernel,
            out_shape=jax.ShapeDtypeStruct((num_blocks * 8, LANES), jnp.float32),
            grid=(num_blocks,),
            in_specs=[
                pl.BlockSpec((block_rows, LANES), lambda i: (i, 0)),
                pl.BlockSpec((block_rows, LANES), lambda i: (i, 0)),
            ],
            out_specs=pl.BlockSpec((8, LANES), lambda i: (i, 0)),
            compiler_params=pltpu.CompilerParams(
                # Each grid step writes its own partial-sum block and carries
                # no state -> parallel axis (megacore sharding on v7x).
                dimension_semantics=("parallel",),
                allow_input_fusion=[True, True],
                vmem_limit_bytes=32 * 1024 * 1024,
            ),
            cost_estimate=pl.CostEstimate(
                flops=3 * bulk,
                transcendentals=0,
                bytes_accessed=2 * bulk * item + num_blocks * 8 * LANES * 4,
            ),
        )(a_slab, b_slab)
        energy = energy + jnp.sum(partials)

    # ---- tail (< one block) + tiny-input fast path: plain jnp ----
    if bulk < total:
        ta = a_flat[bulk:].astype(jnp.float32)
        tb = b_flat[bulk:].astype(jnp.float32)
        energy = energy + jnp.sum((ta - tb) ** 2)

    return (weight * energy).astype(jnp.float32)


class PallasL2DistortionEnergy:
    """Concrete `InterpolationEnergy`: per-shape-weighted L2 distortion."""

    def __init__(self, num_shapes: int = 4):
        # Deterministic per-shape weights (synthetic "parameters").
        self.weights = jnp.arange(1, num_shapes + 1, dtype=jnp.float32) / num_shapes

    def forward_single(self, vert_new, vert_ref, shape_i):
        w = self.weights[shape_i]
        return distortion_energy(w, vert_new, vert_ref)


class InterpolationModule:
    """Interpolation method driven by a local distortion potential."""

    def __init__(self, energy: PallasL2DistortionEnergy):
        self.energy = energy

    def forward(self, vert_new, vert_ref, shape_i):
        # TODO(synk): the PyTorch base class leaves forward() abstract
        # (NotImplementedError); here it delegates to the energy's
        # forward_single hot path, which is the Pallas kernel.
        return self.energy.forward_single(vert_new, vert_ref, shape_i)


if __name__ == "__main__":
    key = jax.random.PRNGKey(0)

    module = InterpolationModule(PallasL2DistortionEnergy(num_shapes=4))
    fwd = jax.jit(module.forward)

    # (N, D, shape_i): exercise single-block + jnp tail, exact-fit / 2-block
    # (no slice, no tail), and multi-chunk in-kernel accumulation paths.
    cases = [
        (500, 3, 2),
        (2048, 4, 1),
        (30000, 3, 3),
    ]
    for idx, (N, D, shape_i) in enumerate(cases):
        k1, k2 = jax.random.split(jax.random.fold_in(key, idx))
        vert_ref = jax.random.normal(k1, (N, D), dtype=jnp.float32)
        vert_new = vert_ref + 0.1 * jax.random.normal(k2, (N, D), dtype=jnp.float32)

        energy = jax.block_until_ready(fwd(vert_new, vert_ref, shape_i))

        # Pure-JAX reference check.
        w = module.energy.weights[shape_i]
        ref = w * jnp.sum((vert_new.astype(jnp.float32)
                           - vert_ref.astype(jnp.float32)) ** 2)
        assert jnp.allclose(energy, ref, rtol=1e-5, atol=1e-5), (N, D, energy, ref)

    print("KERNEL_OK")
</pallas_src>

<mosaic_0001>
module attributes {stable_mosaic.version = 11 : i64} {
  func.func @_sq_diff_partial_kernel(%arg0: i32, %arg1: memref<8x128xf32, #tpu.memory_space<vmem>>, %arg2: memref<8x128xf32, #tpu.memory_space<vmem>>, %arg3: memref<8x128xf32, #tpu.memory_space<vmem>>) attributes {dimension_semantics = [#tpu.dimension_semantics<parallel>], iteration_bounds = array<i64: 1>, scalar_prefetch = 0 : i64, scratch_operands = 0 : i64, tpu.core_type = #tpu.core_type<tc>, window_params = [{transform_indices = @transform_0, window_bounds = array<i64: 8, 128>}, {transform_indices = @transform_1, window_bounds = array<i64: 8, 128>}, {transform_indices = @transform_2, window_bounds = array<i64: 8, 128>}]} {
    %cst = arith.constant 0.000000e+00 : f32
    %0 = vector.broadcast %cst : f32 to vector<8x128xf32>
    %c0 = arith.constant 0 : index
    %c0_0 = arith.constant 0 : index
    %1 = vector.load %arg1[%c0, %c0_0] : memref<8x128xf32, #tpu.memory_space<vmem>>, vector<8x128xf32>
    %c0_1 = arith.constant 0 : index
    %c0_2 = arith.constant 0 : index
    %2 = vector.load %arg2[%c0_1, %c0_2] : memref<8x128xf32, #tpu.memory_space<vmem>>, vector<8x128xf32>
    %3 = arith.subf %1, %2 : vector<8x128xf32>
    %4 = arith.mulf %3, %3 : vector<8x128xf32>
    %5 = vector.shape_cast %4 : vector<8x128xf32> to vector<1x8x128xf32>
    %cst_3 = arith.constant dense<0.000000e+00> : vector<8x128xf32>
    %6 = vector.multi_reduction <add>, %5, %cst_3 [0] : vector<1x8x128xf32> to vector<8x128xf32>
    %7 = arith.addf %0, %6 : vector<8x128xf32>
    %c0_4 = arith.constant 0 : index
    %c0_5 = arith.constant 0 : index
    %8 = vector.load %arg3[%c0_4, %c0_5] : memref<8x128xf32, #tpu.memory_space<vmem>>, vector<8x128xf32>
    tpu.vector_store %arg3[%c0_4, %c0_5], %7 {strides = array<i32>} : memref<8x128xf32, #tpu.memory_space<vmem>>, vector<8x128xf32>,
    return
  }
  func.func @transform_0(%arg0: i32) -> (i32, i32) {
    %c0_i32 = arith.constant 0 : i32
    %c0_i32_0 = arith.constant 0 : i32
    return %arg0, %c0_i32 : i32, i32
  }
  func.func @transform_1(%arg0: i32) -> (i32, i32) {
    %c0_i32 = arith.constant 0 : i32
    %c0_i32_0 = arith.constant 0 : i32
    return %arg0, %c0_i32 : i32, i32
  }
  func.func @transform_2(%arg0: i32) -> (i32, i32) {
    %c0_i32 = arith.constant 0 : i32
    %c0_i32_0 = arith.constant 0 : i32
    return %arg0, %c0_i32 : i32, i32
  }
}

</mosaic_0001>

<bundles_post_ra>
// kernel: forward.2
= control target key start
LH: loop header
LB: loop body
LE: loop exit
PB: predicated region body
PF: predicated region fallthrough
CT: control target
= control target key end

     0   :  { %s54_s0 = inlined_call_operand.vmem [shape: f32[1500], index: 0, kind: input, shape index: {}]   ;;  %s55_s1 = inlined_call_operand.vmem [shape: f32[1500], index: 1, kind: input, shape index: {}]   ;;  %s56_s2 = inlined_call_operand.vmem [shape: f32[8,128], index: 2, kind: output, shape index: {}]  }
   0x1   :  { %v11_v0 = vld [vmem:[%s55_s1] sm:$0xff] }
   0x2   :  { %v15_v1 = vld [vmem:[%s54_s0] sm:$0xff] }
   0x3   :  { %v21_v2 = vsub.f32 %v11_v0, %v15_v1 }
   0x5   :  { %v22_v3 = vmul.f32 %v21_v2, %v21_v2 }
   0x7   :  { %25 = vst [vmem:[%s56_s2] sm:$0xff] %v22_v3 }

</bundles_post_ra>
